<compile_context>
chip_gen: v5e
topology: v5e:2x2
jax: 0.10.0
libtpu: 0.0.40
codegen_flags: <defaults>
</compile_context>

<pallas_src>
import functools

import jax
import jax.numpy as jnp
from jax.experimental import pallas as pl
from jax.experimental.pallas import tpu as pltpu


def _round_up(x, m):
    return (x + m - 1) // m * m


def _embed_dropout_kernel(seed_ref, ids_ref, table_ref, out_ref, *,
                          keep_prob, apply_dropout):
    # seed_ref : SMEM (1,) int32 scalar-prefetch
    # ids_ref  : VMEM (1, 1, TILE_N) int32 token ids for this tile
    # table_ref: VMEM (V, D) embedding table (resident across all grid steps)
    # out_ref  : VMEM (TILE_N, D) output tile
    g = pl.program_id(0)
    tn, d = out_ref.shape
    v = table_ref.shape[0]

    ids = ids_ref[0, 0, :]                                   # (TILE_N,)

    # Gather via one-hot matmul on the MXU.
    vocab_iota = jax.lax.broadcasted_iota(jnp.int32, (tn, v), 1)
    onehot = (ids[:, None] == vocab_iota).astype(table_ref.dtype)
    x = jnp.dot(onehot, table_ref[...], preferred_element_type=jnp.float32)

    if apply_dropout:
        # Stateless per-element hash PRNG (lowbias32) on integer counters.
        row = jax.lax.broadcasted_iota(jnp.int32, (tn, d), 0)
        col = jax.lax.broadcasted_iota(jnp.int32, (tn, d), 1)
        counter = (g * tn + row) * d + col                   # global element idx
        seed_u = seed_ref[0].astype(jnp.uint32)

        h = counter.astype(jnp.uint32) ^ seed_u
        h = (h ^ (h >> 16)) * jnp.uint32(0x7FEB352D)
        h = (h ^ (h >> 15)) * jnp.uint32(0x846CA68B)
        h = h ^ (h >> 16)

        threshold = jnp.uint32(min(int(keep_prob * 4294967296.0), 4294967295))
        keep = h < threshold
        x = jnp.where(keep, x * jnp.float32(1.0 / keep_prob),
                      jnp.zeros_like(x))

    out_ref[...] = x.astype(out_ref.dtype)


def embedding_forward(ids, weight, seed, *, dropout_p=0.5, training=True):
    """ids: (B, T) int ids, weight: (V, D). Returns (B, T, D)."""
    B, T = ids.shape
    V, D = weight.shape
    N = B * T

    flat_ids = jnp.clip(ids.reshape(N).astype(jnp.int32), 0, V - 1)

    # Token tile: big (128) when there is enough work, else round N up to 8.
    TILE_N = 128 if N >= 128 else _round_up(N, 8)
    N_pad = _round_up(N, TILE_N)
    G = N_pad // TILE_N

    ids_pad = jnp.zeros((N_pad,), jnp.int32).at[:N].set(flat_ids)
    ids_tiles = ids_pad.reshape(G, 1, TILE_N)

    keep_prob = 1.0 - float(dropout_p)
    apply_dropout = bool(training) and float(dropout_p) > 0.0

    kernel = functools.partial(
        _embed_dropout_kernel,
        keep_prob=keep_prob,
        apply_dropout=apply_dropout,
    )

    out = pl.pallas_call(
        kernel,
        out_shape=jax.ShapeDtypeStruct((N_pad, D), weight.dtype),
        grid_spec=pltpu.PrefetchScalarGridSpec(
            num_scalar_prefetch=1,                # seed -> SMEM
            grid=(G,),
            in_specs=[
                # token ids for this tile
                pl.BlockSpec((1, 1, TILE_N), lambda g, seed_r: (g, 0, 0)),
                # whole embedding table, VMEM-resident (constant block index)
                pl.BlockSpec((V, D), lambda g, seed_r: (0, 0)),
            ],
            out_specs=pl.BlockSpec((TILE_N, D), lambda g, seed_r: (g, 0)),
        ),
        compiler_params=pltpu.CompilerParams(
            dimension_semantics=("parallel",)),
    )(jnp.asarray([seed], dtype=jnp.int32), ids_tiles, weight)

    return out[:N].reshape(B, T, D)


if __name__ == "__main__":
    key = jax.random.PRNGKey(0)
    k_w, k_ids = jax.random.split(key)

    V, D = 16, 128          # input_size, embedding_size
    B, T = 2, 8             # batch, seq

    # nn.Embedding init ~ N(0, 1); padding_idx=0 row is zeroed.
    weight = jax.random.normal(k_w, (V, D), dtype=jnp.float32)
    weight = weight.at[0].set(0.0)

    ids = jax.random.randint(k_ids, (B, T), 0, V, dtype=jnp.int32)

    # Eval-mode pass (dropout identity) — checks the gather path.
    out_eval = embedding_forward(ids, weight, seed=0,
                                 dropout_p=0.5, training=False)
    jax.block_until_ready(out_eval)
    ref = jnp.take(weight, ids, axis=0)
    assert out_eval.shape == (B, T, D)
    assert jnp.allclose(out_eval, ref, atol=1e-5), "embedding gather mismatch"

    # Training-mode pass (deterministic in-kernel dropout, p=0.5).
    out_train = embedding_forward(ids, weight, seed=1234,
                                  dropout_p=0.5, training=True)
    jax.block_until_ready(out_train)
    assert out_train.shape == (B, T, D)
    # Every element is either dropped (0) or scaled by 1/keep_prob.
    keep_prob = 0.5
    ok = (out_train == 0) | jnp.isclose(out_train, ref / keep_prob, atol=1e-5)
    assert bool(jnp.all(ok)), "dropout values not in {0, x/keep_prob}"

    print("KERNEL_OK")
</pallas_src>

<mosaic_0001>
module attributes {stable_mosaic.version = 11 : i64} {
  func.func @_embed_dropout_kernel(%arg0: i32, %arg1: memref<1xi32, #tpu.memory_space<smem>>, %arg2: memref<1x1x16xi32, #tpu.memory_space<vmem>>, %arg3: memref<16x128xf32, #tpu.memory_space<vmem>>, %arg4: memref<16x128xf32, #tpu.memory_space<vmem>>) attributes {dimension_semantics = [#tpu.dimension_semantics<parallel>], iteration_bounds = array<i64: 1>, scalar_prefetch = 1 : i64, scratch_operands = 0 : i64, tpu.core_type = #tpu.core_type<tc>, window_params = [{transform_indices = @transform_0, window_bounds = array<i64: 1, 1, 16>}, {pipeline_mode = #tpu.pipeline_mode<synchronous>, transform_indices = @transform_1, window_bounds = array<i64: 16, 128>}, {transform_indices = @transform_2, window_bounds = array<i64: 16, 128>}]} {
    %c0 = arith.constant 0 : index
    %c0_0 = arith.constant 0 : index
    %c0_1 = arith.constant 0 : index
    %0 = vector.load %arg2[%c0, %c0_0, %c0_1] : memref<1x1x16xi32, #tpu.memory_space<vmem>>, vector<1x1x16xi32>
    %1 = vector.shape_cast %0 : vector<1x1x16xi32> to vector<16xi32>
    %2 = tpu.iota {dimensions = array<i32: 1>} : vector<16x16xi32>
    %3 = vector.shape_cast %1 : vector<16xi32> to vector<16x1xi32>
    %4 = vector.broadcast %3 : vector<16x1xi32> to vector<16x16xi32>
    %5 = arith.cmpi eq, %4, %2 : vector<16x16xi32>
    %6 = arith.extui %5 : vector<16x16xi1> to vector<16x16xi32>
    %7 = arith.sitofp %6 : vector<16x16xi32> to vector<16x16xf32>
    %c0_2 = arith.constant 0 : index
    %c0_3 = arith.constant 0 : index
    %8 = vector.load %arg3[%c0_2, %c0_3] : memref<16x128xf32, #tpu.memory_space<vmem>>, vector<16x128xf32>
    %cst = arith.constant dense<0.000000e+00> : vector<16x128xf32>
    %9 = tpu.matmul %7, %8, %cst {dimension_numbers = #tpu.dot_dimension_numbers<[1], [0], [0], [1], [0, 0, 1, 1], [], []>} : vector<16x16xf32>, vector<16x128xf32>, vector<16x128xf32> -> vector<16x128xf32>
    %c0_4 = arith.constant 0 : index
    %c0_5 = arith.constant 0 : index
    %10 = vector.load %arg4[%c0_4, %c0_5] : memref<16x128xf32, #tpu.memory_space<vmem>>, vector<16x128xf32>
    tpu.vector_store %arg4[%c0_4, %c0_5], %9 {strides = array<i32>} : memref<16x128xf32, #tpu.memory_space<vmem>>, vector<16x128xf32>,
    return
  }
  func.func @transform_0(%arg0: i32, %arg1: memref<1xi32, #tpu.memory_space<smem>>) -> (i32, i32, i32) {
    %c0_i32 = arith.constant 0 : i32
    %c0_i32_0 = arith.constant 0 : i32
    %c0_i32_1 = arith.constant 0 : i32
    return %arg0, %c0_i32, %c0_i32_0 : i32, i32, i32
  }
  func.func @transform_1(%arg0: i32, %arg1: memref<1xi32, #tpu.memory_space<smem>>) -> (i32, i32) {
    %c0_i32 = arith.constant 0 : i32
    %c0_i32_0 = arith.constant 0 : i32
    %c0_i32_1 = arith.constant 0 : i32
    return %c0_i32, %c0_i32_0 : i32, i32
  }
  func.func @transform_2(%arg0: i32, %arg1: memref<1xi32, #tpu.memory_space<smem>>) -> (i32, i32) {
    %c0_i32 = arith.constant 0 : i32
    %c0_i32_0 = arith.constant 0 : i32
    return %arg0, %c0_i32 : i32, i32
  }
}

</mosaic_0001>

<bundles_post_ra>
// kernel: tpu_custom_call.1
= control target key start
LH: loop header
LB: loop body
LE: loop exit
PB: predicated region body
PF: predicated region fallthrough
CT: control target
= control target key end

     0   :  { %9 = vsyncpa [#allocation5], 0  ;;  %s211_s0 = inlined_call_operand.<no memory space> [shape: s32[1], index: 0, kind: input, shape index: {}]   ;;  %s212_s1 = inlined_call_operand.vmem [shape: s32[1,1,16], index: 1, kind: input, shape index: {}]   ;;  %s213_s2 = inlined_call_operand.hbm [shape: f32[16,128], index: 2, kind: input, shape index: {}]   ;;  %s214_s3 = inlined_call_operand.hbm [shape: f32[16,128], index: 3, kind: output, shape index: {}]  }
   0x1   :  { %10 = vsyncpa [#allocation6], 0  ;;  %s17_s14 = sshll.u32 %s213_s2, 4  ;;  %s171_s15 = smov [#allocation4]   ;;  %s18_s14 = int_to_ptr.hbm [resolvable:$true] %s17_s14 }
   0x2   :  { %s19_s16 = sshll.u32 %s171_s15, 4  ;;  %s172_s0 = smov 128   ;;  %s20_s16 = int_to_ptr.vmem [resolvable:$true] %s19_s16 }
   0x3   :  { %s173_s17 = smov 8  }
   0x4   :  { %25 = dma.hbm_to_vmem [thread:$0]  %s18_s14, 256, %s20_s16, [#allocation5], %s172_s0, %s172_s0, %s173_s17  }
   0x5   :  { %167 = dma.done.wait [#allocation5], 256  }
   0x6   :  { %168 = vsyncadd [#allocation5], 4294967040  ;;  %v31_v0 = vlaneseq  ;;  %v53_v2 = vld [vmem:[#allocation4 + $0x8] sm:$0xff]  ;;  %v118_v3 = vld [vmem:[%s212_s1] ss:$0 sm:$0xff]  ;;  %vm54_vm0 = vcmask 130048  }
   0x7   :  { %75 = vmatpush.msra.mxu0 %v53_v2  ;;  %109 = vmatpush.msra.mxu1 %v53_v2  ;;  %v52_v5 = vld [vmem:[#allocation4] sm:$0xff]  ;;  %v174_v8 = vmov 0.0   ;;  %s175_s1 = smov [#allocation7]   ;;  %s92_s22 = sshll.u32 %s214_s3, 4  ;;  %s93_s22 = int_to_ptr.hbm [resolvable:$true] %s92_s22 }
   0x8   :  { %v35_v1 = vshrl.u32 %v31_v0, 7  ;;  %v32_v6 = vand.u32 127, %v31_v0  ;;  %s90_s2 = sshll.u32 %s175_s1, 4  ;;  %s91_s2 = int_to_ptr.vmem [resolvable:$true] %s90_s2 }
   0x9   :  { %76 = vmatpush.msra.mxu0 %v52_v5  ;;  %110 = vmatpush.msra.mxu1 %v52_v5 }
   0xa   :  { %116 = vset.pattern.permute.xlu0 %v35_v1  ;;  %v42_v4 = vadd.s32 8, %v35_v1 }
  0x12   :  { %38 = vperm.xlu0 %116, %v118_v3  }
  0x1a   :  { %117 = vset.pattern.permute.xlu0 %v42_v4 }
  0x22   :  { %44 = vperm.xlu0 %117, %v118_v3  }
  0x84   :  { %v39_v7 = vpop.permute.xlu0 %38 }
  0x85   :  { %vm46_vm1 = vcmp.eq.s32.totalorder %v39_v7, %v32_v6 }
  0x86   :  { %v105_v9 = vsel %vm46_vm1, 1.0, %v174_v8 }
  0x87   :  { %107 = vmatmul.msk.f32.vlgmr.msra.gmra.mxu0 %vm54_vm0, %v105_v9 }
  0x94   :  { %v45_v10 = vpop.permute.xlu0 %44 }
  0x95   :  { %vm47_vm2 = vcmp.eq.s32.totalorder %v45_v10, %v32_v6 }
  0x96   :  { %v106_v11 = vsel %vm47_vm2, 1.0, %v174_v8 }
  0x97   :  { %108 = vmatmul.msk.f32.vlgmr.msra.gmra.mxu1 %vm54_vm0, %v106_v11 }
 0x104   :  { %v78_v12 = vpop.f32.mrf.mxu0 }
 0x105   :  { %84 = vst [vmem:[#allocation7] sm:$0xff] %v78_v12 }
 0x114   :  { %v81_v13 = vpop.f32.mrf.mxu1 }
 0x115   :  { %85 = vst [vmem:[#allocation7 + $0x8] sm:$0xff] %v81_v13 }
 0x116   :  { %98 = dma.vmem_to_hbm [thread:$0]  %s91_s2, 256, %s93_s22, [#allocation6], %s172_s0, %s172_s0, %s173_s17  }
 0x117   :  { %169 = dma.done.wait [#allocation6], 256  }
 0x118   :  { %170 = vsyncadd [#allocation6], 4294967040 }
 0x119   :  { %103 = vsyncpa [#allocation5], 1 }
 0x11a   :  { %104 = vsyncpa [#allocation6], 1 }

</bundles_post_ra>
